<compile_context>
chip_gen: v5e
topology: v5e:2x2
jax: 0.10.0
libtpu: 0.0.40
codegen_flags: <defaults>
</compile_context>

<pallas_src>
import jax
import jax.numpy as jnp
from jax import lax
from jax.experimental import pallas as pl
from jax.experimental.pallas import tpu as pltpu

_LANES = 128
_EPS_SQ = 1e-24  # matches torch F.normalize: 1 / max(||v||, 1e-12)


def _round_up(a, m):
    return ((a + m - 1) // m) * m


def _rot6d_kernel(in_ref, out_ref):
    """in_ref : (6, TR, 128) planes in natural 6D memory order
                [ax, bx, ay, by, az, bz]  (f32 or bf16)
       out_ref: (9, TR, 128) planes = row-major 3x3 entries
                [b1x, b2x, b3x, b1y, b2y, b3y, b1z, b2z, b3z]."""
    f32 = jnp.float32
    ax = in_ref[0, :, :].astype(f32)
    bx = in_ref[1, :, :].astype(f32)
    ay = in_ref[2, :, :].astype(f32)
    by = in_ref[3, :, :].astype(f32)
    az = in_ref[4, :, :].astype(f32)
    bz = in_ref[5, :, :].astype(f32)

    eps_sq = jnp.float32(_EPS_SQ)

    # b1 = a / max(||a||, 1e-12)  -> one rsqrt (EUP) + VPU muls, no divides.
    inv_a = lax.rsqrt(jnp.maximum(ax * ax + ay * ay + az * az, eps_sq))
    b1x = ax * inv_a
    b1y = ay * inv_a
    b1z = az * inv_a

    # Gram-Schmidt: u = b - <b1, b> b1 ; b2 = u / max(||u||, 1e-12)
    dot = b1x * bx + b1y * by + b1z * bz
    ux = bx - dot * b1x
    uy = by - dot * b1y
    uz = bz - dot * b1z
    inv_u = lax.rsqrt(jnp.maximum(ux * ux + uy * uy + uz * uz, eps_sq))
    b2x = ux * inv_u
    b2y = uy * inv_u
    b2z = uz * inv_u

    # b3 = b1 x b2
    b3x = b1y * b2z - b1z * b2y
    b3y = b1z * b2x - b1x * b2z
    b3z = b1x * b2y - b1y * b2x

    # All nine writes are full (TR, 128) lane-dense stores.
    odt = out_ref.dtype
    out_ref[0, :, :] = b1x.astype(odt)
    out_ref[1, :, :] = b2x.astype(odt)
    out_ref[2, :, :] = b3x.astype(odt)
    out_ref[3, :, :] = b1y.astype(odt)
    out_ref[4, :, :] = b2y.astype(odt)
    out_ref[5, :, :] = b3y.astype(odt)
    out_ref[6, :, :] = b1z.astype(odt)
    out_ref[7, :, :] = b2z.astype(odt)
    out_ref[8, :, :] = b3z.astype(odt)


def _rot6d_planes_padded(planes6, *, row_tile=1024):
    """planes6: (6, n) in rows [ax, bx, ay, by, az, bz] (f32 or bf16).
    Returns (9, n_pad) planes (row-major 3x3 entries); columns >= n are the
    zero-padding tail (all-zero rows, no NaN: rsqrt(eps)*0 == 0)."""
    io_dtype = planes6.dtype
    if io_dtype not in (jnp.float32, jnp.bfloat16):
        planes6 = planes6.astype(jnp.float32)
        io_dtype = jnp.float32

    n = planes6.shape[1]
    itemsize = jnp.dtype(io_dtype).itemsize
    sub = max(8, 32 // itemsize)            # sublane alignment: f32 -> 8, bf16 -> 16

    n_rows = pl.cdiv(n, _LANES)
    # Big tiles amortize the ~0.35 us per-grid-step overhead; keep >= 2 steps
    # when possible so the "parallel" axis can shard over v7x's 2 TensorCores.
    row_tile = _round_up(max(row_tile, sub), sub)
    tr = max(sub, min(row_tile, _round_up(pl.cdiv(n_rows, 2), sub)))
    n_rows_pad = _round_up(n_rows, tr)
    n_pad = n_rows_pad * _LANES

    if n_pad != n:
        planes6 = jnp.pad(planes6, ((0, 0), (0, n_pad - n)))   # zero pad: NaN-safe
    comp = planes6.reshape(6, n_rows_pad, _LANES)

    out = pl.pallas_call(
        _rot6d_kernel,
        out_shape=jax.ShapeDtypeStruct((9, n_rows_pad, _LANES), io_dtype),
        grid=(n_rows_pad // tr,),
        in_specs=[pl.BlockSpec((6, tr, _LANES), lambda i: (0, i, 0))],
        out_specs=pl.BlockSpec((9, tr, _LANES), lambda i: (0, i, 0)),
        compiler_params=pltpu.CompilerParams(
            dimension_semantics=("parallel",),
            # Let XLA fuse the producing (n,6)->(6,n) transpose into the
            # pallas operand instead of materializing it in HBM.
            allow_input_fusion=[True],
            # tr=1024 f32 is ~15.7 MiB double-buffered; raise the scoped VMEM
            # limit so the same tile works on v5e (16 MiB default) and v7x.
            vmem_limit_bytes=48 * 1024 * 1024,
        ),
    )(comp)

    return out.reshape(9, n_pad)


def rot6d_planes_forward(planes6, *, keep_padding=False, row_tile=1024):
    """Kernel-native layout API (no boundary transposes -> minimal HBM bytes).

    planes6: (6, n) rows [ax, bx, ay, by, az, bz]  ->  (9, n) rows = row-major
    flattened rotation matrices. With keep_padding=True the padded (9, n_pad)
    slab is returned directly (tail columns are zeros) so no slice copy is made.
    """
    out = _rot6d_planes_padded(planes6, row_tile=row_tile)
    if keep_padding:
        return out
    return out[:, :planes6.shape[1]]


def _pallas_rot6d_forward(module_input, num_angles, *, row_tile=1024):
    """Module-parity path: (B, num_angles*6) -> (B, num_angles, 3, 3)."""
    B = module_input.shape[0]
    n = B * num_angles
    x = jnp.asarray(module_input)
    if x.dtype not in (jnp.float32, jnp.bfloat16):
        x = x.astype(jnp.float32)

    # The raw 6D memory order per rotation is already [ax, bx, ay, by, az, bz],
    # so the only input relayout is a single (n, 6) -> (6, n) transpose
    # (candidate for allow_input_fusion above).
    planes_in = x.reshape(n, 6).T
    planes_out = _rot6d_planes_padded(planes_in, row_tile=row_tile)   # (9, n_pad)

    # (9, n) -> (n, 9) -> (B, num_angles, 3, 3). Kept only because the module
    # contract requires this layout; fused consumers should use
    # rot6d_planes_forward instead (saves ~72 B/rotation of HBM traffic).
    return planes_out[:, :n].T.reshape(B, num_angles, 3, 3)


def reference_forward(module_input, num_angles):
    """Pure-JAX mirror of the PyTorch forward for verification."""
    B = module_input.shape[0]
    r = module_input.reshape(-1, 3, 2).astype(jnp.float32)
    a = r[:, :, 0]
    b = r[:, :, 1]

    def normalize(v):
        norm = jnp.linalg.norm(v, axis=1, keepdims=True)
        return v / jnp.maximum(norm, 1e-12)

    b1 = normalize(a)
    dot = jnp.sum(b1 * b, axis=1, keepdims=True)
    b2 = normalize(b - dot * b1)
    b3 = jnp.cross(b1, b2)
    rot = jnp.stack([b1, b2, b3], axis=-1)
    return rot.reshape(B, num_angles, 3, 3)


def continuous_rot_repr_forward(module_input, num_angles, *, force_pallas=False,
                                row_tile=1024):
    # Below a few hundred rotations the pallas_call launch + padding dwarfs
    # the math, so dispatch to plain XLA there.
    if not force_pallas and module_input.shape[0] * num_angles < 512:
        return reference_forward(module_input, num_angles)
    return _pallas_rot6d_forward(module_input, num_angles, row_tile=row_tile)


if __name__ == "__main__":
    B = 2
    NUM_ANGLES = 21  # e.g. SMPL body pose

    key = jax.random.PRNGKey(0)
    # Module's default mean is [1,0,0,1,0,0] per angle; perturb around it.
    base = jnp.tile(jnp.array([1.0, 0.0, 0.0, 1.0, 0.0, 0.0], jnp.float32),
                    (NUM_ANGLES,))
    noise = 0.3 * jax.random.normal(key, (B, NUM_ANGLES * 6), dtype=jnp.float32)
    module_input = base[None, :] + noise                    # (2, 126)

    ref = reference_forward(module_input, NUM_ANGLES)

    # 1) Module-parity path (f32), forcing the Pallas kernel.
    out = continuous_rot_repr_forward(module_input, NUM_ANGLES, force_pallas=True)
    out = jax.block_until_ready(out)
    assert out.shape == (B, NUM_ANGLES, 3, 3)
    max_diff = float(jnp.max(jnp.abs(out - ref)))
    assert max_diff < 1e-4, f"f32 max abs diff = {max_diff}"

    # Sanity: outputs are valid rotations (orthonormal columns).
    eye = jnp.eye(3, dtype=jnp.float32)
    rtr = jnp.einsum('bnij,bnkj->bnik', out, out)
    assert float(jnp.max(jnp.abs(rtr - eye))) < 1e-4

    # 2) Kernel-native planes path (no boundary transposes).
    n = B * NUM_ANGLES
    planes_in = module_input.reshape(n, 6).T                # (6, n)
    planes_out = rot6d_planes_forward(planes_in)            # (9, n)
    planes_out = jax.block_until_ready(planes_out)
    ref_planes = ref.reshape(n, 9).T
    max_diff_p = float(jnp.max(jnp.abs(planes_out - ref_planes)))
    assert max_diff_p < 1e-4, f"planes max abs diff = {max_diff_p}"

    # 3) bf16 I/O path (halves HBM bytes; math still f32 in-kernel).
    x_bf16 = module_input.astype(jnp.bfloat16)
    out_bf = continuous_rot_repr_forward(x_bf16, NUM_ANGLES, force_pallas=True)
    out_bf = jax.block_until_ready(out_bf)
    ref_bf = reference_forward(x_bf16.astype(jnp.float32), NUM_ANGLES)
    max_diff_bf = float(jnp.max(jnp.abs(out_bf.astype(jnp.float32) - ref_bf)))
    assert max_diff_bf < 1e-2, f"bf16 max abs diff = {max_diff_bf}"

    print("KERNEL_OK")
</pallas_src>

<mosaic_0001>
module attributes {stable_mosaic.version = 11 : i64} {
  func.func @_rot6d_kernel(%arg0: i32, %arg1: memref<6x8x128xf32, #tpu.memory_space<vmem>>, %arg2: memref<9x8x128xf32, #tpu.memory_space<vmem>>) attributes {dimension_semantics = [#tpu.dimension_semantics<parallel>], iteration_bounds = array<i64: 1>, scalar_prefetch = 0 : i64, scratch_operands = 0 : i64, tpu.core_type = #tpu.core_type<tc>, window_params = [{transform_indices = @transform_0, window_bounds = array<i64: 6, 8, 128>}, {transform_indices = @transform_1, window_bounds = array<i64: 9, 8, 128>}]} {
    %c0 = arith.constant 0 : index
    %c0_0 = arith.constant 0 : index
    %c0_1 = arith.constant 0 : index
    %0 = vector.load %arg1[%c0, %c0_0, %c0_1] : memref<6x8x128xf32, #tpu.memory_space<vmem>>, vector<1x8x128xf32>
    %1 = vector.shape_cast %0 : vector<1x8x128xf32> to vector<8x128xf32>
    %c1 = arith.constant 1 : index
    %c0_2 = arith.constant 0 : index
    %c0_3 = arith.constant 0 : index
    %2 = vector.load %arg1[%c1, %c0_2, %c0_3] : memref<6x8x128xf32, #tpu.memory_space<vmem>>, vector<1x8x128xf32>
    %3 = vector.shape_cast %2 : vector<1x8x128xf32> to vector<8x128xf32>
    %c2 = arith.constant 2 : index
    %c0_4 = arith.constant 0 : index
    %c0_5 = arith.constant 0 : index
    %4 = vector.load %arg1[%c2, %c0_4, %c0_5] : memref<6x8x128xf32, #tpu.memory_space<vmem>>, vector<1x8x128xf32>
    %5 = vector.shape_cast %4 : vector<1x8x128xf32> to vector<8x128xf32>
    %c3 = arith.constant 3 : index
    %c0_6 = arith.constant 0 : index
    %c0_7 = arith.constant 0 : index
    %6 = vector.load %arg1[%c3, %c0_6, %c0_7] : memref<6x8x128xf32, #tpu.memory_space<vmem>>, vector<1x8x128xf32>
    %7 = vector.shape_cast %6 : vector<1x8x128xf32> to vector<8x128xf32>
    %c4 = arith.constant 4 : index
    %c0_8 = arith.constant 0 : index
    %c0_9 = arith.constant 0 : index
    %8 = vector.load %arg1[%c4, %c0_8, %c0_9] : memref<6x8x128xf32, #tpu.memory_space<vmem>>, vector<1x8x128xf32>
    %9 = vector.shape_cast %8 : vector<1x8x128xf32> to vector<8x128xf32>
    %c5 = arith.constant 5 : index
    %c0_10 = arith.constant 0 : index
    %c0_11 = arith.constant 0 : index
    %10 = vector.load %arg1[%c5, %c0_10, %c0_11] : memref<6x8x128xf32, #tpu.memory_space<vmem>>, vector<1x8x128xf32>
    %11 = vector.shape_cast %10 : vector<1x8x128xf32> to vector<8x128xf32>
    %12 = arith.mulf %1, %1 : vector<8x128xf32>
    %13 = arith.mulf %5, %5 : vector<8x128xf32>
    %14 = arith.addf %12, %13 : vector<8x128xf32>
    %15 = arith.mulf %9, %9 : vector<8x128xf32>
    %16 = arith.addf %14, %15 : vector<8x128xf32>
    %cst = arith.constant 1.000000e-24 : f32
    %17 = vector.broadcast %cst : f32 to vector<8x128xf32>
    %18 = arith.maximumf %16, %17 : vector<8x128xf32>
    %19 = math.rsqrt %18 : vector<8x128xf32>
    %20 = arith.mulf %1, %19 : vector<8x128xf32>
    %21 = arith.mulf %5, %19 : vector<8x128xf32>
    %22 = arith.mulf %9, %19 : vector<8x128xf32>
    %23 = arith.mulf %20, %3 : vector<8x128xf32>
    %24 = arith.mulf %21, %7 : vector<8x128xf32>
    %25 = arith.addf %23, %24 : vector<8x128xf32>
    %26 = arith.mulf %22, %11 : vector<8x128xf32>
    %27 = arith.addf %25, %26 : vector<8x128xf32>
    %28 = arith.mulf %27, %20 : vector<8x128xf32>
    %29 = arith.subf %3, %28 : vector<8x128xf32>
    %30 = arith.mulf %27, %21 : vector<8x128xf32>
    %31 = arith.subf %7, %30 : vector<8x128xf32>
    %32 = arith.mulf %27, %22 : vector<8x128xf32>
    %33 = arith.subf %11, %32 : vector<8x128xf32>
    %34 = arith.mulf %29, %29 : vector<8x128xf32>
    %35 = arith.mulf %31, %31 : vector<8x128xf32>
    %36 = arith.addf %34, %35 : vector<8x128xf32>
    %37 = arith.mulf %33, %33 : vector<8x128xf32>
    %38 = arith.addf %36, %37 : vector<8x128xf32>
    %cst_12 = arith.constant 1.000000e-24 : f32
    %39 = vector.broadcast %cst_12 : f32 to vector<8x128xf32>
    %40 = arith.maximumf %38, %39 : vector<8x128xf32>
    %41 = math.rsqrt %40 : vector<8x128xf32>
    %42 = arith.mulf %29, %41 : vector<8x128xf32>
    %43 = arith.mulf %31, %41 : vector<8x128xf32>
    %44 = arith.mulf %33, %41 : vector<8x128xf32>
    %45 = arith.mulf %21, %44 : vector<8x128xf32>
    %46 = arith.mulf %22, %43 : vector<8x128xf32>
    %47 = arith.subf %45, %46 : vector<8x128xf32>
    %48 = arith.mulf %22, %42 : vector<8x128xf32>
    %49 = arith.mulf %20, %44 : vector<8x128xf32>
    %50 = arith.subf %48, %49 : vector<8x128xf32>
    %51 = arith.mulf %20, %43 : vector<8x128xf32>
    %52 = arith.mulf %21, %42 : vector<8x128xf32>
    %53 = arith.subf %51, %52 : vector<8x128xf32>
    %c0_13 = arith.constant 0 : index
    %c0_14 = arith.constant 0 : index
    %c0_15 = arith.constant 0 : index
    %54 = vector.load %arg2[%c0_13, %c0_14, %c0_15] : memref<9x8x128xf32, #tpu.memory_space<vmem>>, vector<1x8x128xf32>
    %55 = vector.shape_cast %54 : vector<1x8x128xf32> to vector<8x128xf32>
    %56 = vector.shape_cast %20 : vector<8x128xf32> to vector<1x8x128xf32>
    tpu.vector_store %arg2[%c0_13, %c0_14, %c0_15], %56 {strides = array<i32>} : memref<9x8x128xf32, #tpu.memory_space<vmem>>, vector<1x8x128xf32>,
    %c1_16 = arith.constant 1 : index
    %c0_17 = arith.constant 0 : index
    %c0_18 = arith.constant 0 : index
    %57 = vector.load %arg2[%c1_16, %c0_17, %c0_18] : memref<9x8x128xf32, #tpu.memory_space<vmem>>, vector<1x8x128xf32>
    %58 = vector.shape_cast %57 : vector<1x8x128xf32> to vector<8x128xf32>
    %59 = vector.shape_cast %42 : vector<8x128xf32> to vector<1x8x128xf32>
    tpu.vector_store %arg2[%c1_16, %c0_17, %c0_18], %59 {strides = array<i32>} : memref<9x8x128xf32, #tpu.memory_space<vmem>>, vector<1x8x128xf32>,
    %c2_19 = arith.constant 2 : index
    %c0_20 = arith.constant 0 : index
    %c0_21 = arith.constant 0 : index
    %60 = vector.load %arg2[%c2_19, %c0_20, %c0_21] : memref<9x8x128xf32, #tpu.memory_space<vmem>>, vector<1x8x128xf32>
    %61 = vector.shape_cast %60 : vector<1x8x128xf32> to vector<8x128xf32>
    %62 = vector.shape_cast %47 : vector<8x128xf32> to vector<1x8x128xf32>
    tpu.vector_store %arg2[%c2_19, %c0_20, %c0_21], %62 {strides = array<i32>} : memref<9x8x128xf32, #tpu.memory_space<vmem>>, vector<1x8x128xf32>,
    %c3_22 = arith.constant 3 : index
    %c0_23 = arith.constant 0 : index
    %c0_24 = arith.constant 0 : index
    %63 = vector.load %arg2[%c3_22, %c0_23, %c0_24] : memref<9x8x128xf32, #tpu.memory_space<vmem>>, vector<1x8x128xf32>
    %64 = vector.shape_cast %63 : vector<1x8x128xf32> to vector<8x128xf32>
    %65 = vector.shape_cast %21 : vector<8x128xf32> to vector<1x8x128xf32>
    tpu.vector_store %arg2[%c3_22, %c0_23, %c0_24], %65 {strides = array<i32>} : memref<9x8x128xf32, #tpu.memory_space<vmem>>, vector<1x8x128xf32>,
    %c4_25 = arith.constant 4 : index
    %c0_26 = arith.constant 0 : index
    %c0_27 = arith.constant 0 : index
    %66 = vector.load %arg2[%c4_25, %c0_26, %c0_27] : memref<9x8x128xf32, #tpu.memory_space<vmem>>, vector<1x8x128xf32>
    %67 = vector.shape_cast %66 : vector<1x8x128xf32> to vector<8x128xf32>
    %68 = vector.shape_cast %43 : vector<8x128xf32> to vector<1x8x128xf32>
    tpu.vector_store %arg2[%c4_25, %c0_26, %c0_27], %68 {strides = array<i32>} : memref<9x8x128xf32, #tpu.memory_space<vmem>>, vector<1x8x128xf32>,
    %c5_28 = arith.constant 5 : index
    %c0_29 = arith.constant 0 : index
    %c0_30 = arith.constant 0 : index
    %69 = vector.load %arg2[%c5_28, %c0_29, %c0_30] : memref<9x8x128xf32, #tpu.memory_space<vmem>>, vector<1x8x128xf32>
    %70 = vector.shape_cast %69 : vector<1x8x128xf32> to vector<8x128xf32>
    %71 = vector.shape_cast %50 : vector<8x128xf32> to vector<1x8x128xf32>
    tpu.vector_store %arg2[%c5_28, %c0_29, %c0_30], %71 {strides = array<i32>} : memref<9x8x128xf32, #tpu.memory_space<vmem>>, vector<1x8x128xf32>,
    %c6 = arith.constant 6 : index
    %c0_31 = arith.constant 0 : index
    %c0_32 = arith.constant 0 : index
    %72 = vector.load %arg2[%c6, %c0_31, %c0_32] : memref<9x8x128xf32, #tpu.memory_space<vmem>>, vector<1x8x128xf32>
    %73 = vector.shape_cast %72 : vector<1x8x128xf32> to vector<8x128xf32>
    %74 = vector.shape_cast %22 : vector<8x128xf32> to vector<1x8x128xf32>
    tpu.vector_store %arg2[%c6, %c0_31, %c0_32], %74 {strides = array<i32>} : memref<9x8x128xf32, #tpu.memory_space<vmem>>, vector<1x8x128xf32>,
    %c7 = arith.constant 7 : index
    %c0_33 = arith.constant 0 : index
    %c0_34 = arith.constant 0 : index
    %75 = vector.load %arg2[%c7, %c0_33, %c0_34] : memref<9x8x128xf32, #tpu.memory_space<vmem>>, vector<1x8x128xf32>
    %76 = vector.shape_cast %75 : vector<1x8x128xf32> to vector<8x128xf32>
    %77 = vector.shape_cast %44 : vector<8x128xf32> to vector<1x8x128xf32>
    tpu.vector_store %arg2[%c7, %c0_33, %c0_34], %77 {strides = array<i32>} : memref<9x8x128xf32, #tpu.memory_space<vmem>>, vector<1x8x128xf32>,
    %c8 = arith.constant 8 : index
    %c0_35 = arith.constant 0 : index
    %c0_36 = arith.constant 0 : index
    %78 = vector.load %arg2[%c8, %c0_35, %c0_36] : memref<9x8x128xf32, #tpu.memory_space<vmem>>, vector<1x8x128xf32>
    %79 = vector.shape_cast %78 : vector<1x8x128xf32> to vector<8x128xf32>
    %80 = vector.shape_cast %53 : vector<8x128xf32> to vector<1x8x128xf32>
    tpu.vector_store %arg2[%c8, %c0_35, %c0_36], %80 {strides = array<i32>} : memref<9x8x128xf32, #tpu.memory_space<vmem>>, vector<1x8x128xf32>,
    return
  }
  func.func @transform_0(%arg0: i32) -> (i32, i32, i32) {
    %c0_i32 = arith.constant 0 : i32
    %c0_i32_0 = arith.constant 0 : i32
    %c0_i32_1 = arith.constant 0 : i32
    return %c0_i32, %arg0, %c0_i32_0 : i32, i32, i32
  }
  func.func @transform_1(%arg0: i32) -> (i32, i32, i32) {
    %c0_i32 = arith.constant 0 : i32
    %c0_i32_0 = arith.constant 0 : i32
    %c0_i32_1 = arith.constant 0 : i32
    return %c0_i32, %arg0, %c0_i32_0 : i32, i32, i32
  }
}

</mosaic_0001>

<bundles_post_ra>
// kernel: tpu_custom_call.1
= control target key start
LH: loop header
LB: loop body
LE: loop exit
PB: predicated region body
PF: predicated region fallthrough
CT: control target
= control target key end

     0   :  { %6 = vsyncpa [#allocation3], 0  ;;  %s216_s0 = inlined_call_operand.hbm [shape: f32[6,8,128], index: 0, kind: input, shape index: {}]   ;;  %s217_s1 = inlined_call_operand.hbm [shape: f32[9,8,128], index: 1, kind: output, shape index: {}]  }
   0x1   :  { %7 = vsyncpa [#allocation4], 0  ;;  %s12_s8 = sshll.u32 %s216_s0, 4  ;;  %s190_s9 = smov [#allocation2]   ;;  %s13_s8 = int_to_ptr.hbm [resolvable:$true] %s12_s8 }
   0x2   :  { %s14_s10 = sshll.u32 %s190_s9, 4  ;;  %s191_s11 = smov 128   ;;  %s15_s10 = int_to_ptr.vmem [resolvable:$true] %s14_s10 }
   0x3   :  { %s192_s12 = smov 8  }
   0x4   :  { %20 = dma.hbm_to_vmem [thread:$0]  %s13_s8, 768, %s15_s10, [#allocation3], %s191_s11, %s191_s11, %s192_s12  }
   0x5   :  { %186 = dma.done.wait [#allocation3], 768  }
   0x6   :  { %187 = vsyncadd [#allocation3], 4294966528  ;;  %v25_v0 = vld [vmem:[#allocation2] sm:$0xff]  ;;  %v29_v1 = vld [vmem:[#allocation2 + $0x10] sm:$0xff]  ;;  %s193_s0 = smov [#allocation5]   ;;  %s117_s16 = sshll.u32 %s217_s1, 4  ;;  %s118_s16 = int_to_ptr.hbm [resolvable:$true] %s117_s16 }
   0x7   :  { %v33_v2 = vld [vmem:[#allocation2 + $0x20] sm:$0xff]  ;;  %v36_v3 = vmul.f32 %v25_v0, %v25_v0  ;;  %v37_v4 = vmul.f32 %v29_v1, %v29_v1  ;;  %v27_v16 = vld [vmem:[#allocation2 + $0x8] sm:$0xff]  ;;  %v31_v17 = vld [vmem:[#allocation2 + $0x18] sm:$0xff]  ;;  %s115_s13 = sshll.u32 %s193_s0, 4  ;;  %s116_s13 = int_to_ptr.vmem [resolvable:$true] %s115_s13 }
   0x8   :  { %v39_v5 = vmul.f32 %v33_v2, %v33_v2  ;;  %v35_v18 = vld [vmem:[#allocation2 + $0x28] sm:$0xff] }
   0x9   :  { %v38_v6 = vadd.f32 %v37_v4, %v36_v3 }
   0xb   :  { %v40_v7 = vadd.f32 %v39_v5, %v38_v6 }
   0xd   :  { %v41_v8 = vmax.f32 %v40_v7, 1e-24 }
   0xf   :  { %134 = vrsqrt.f32 %v41_v8  ;;  %vm48_vm0 = vweird.f32 %v41_v8 }
  0x15   :  { %v135_v9 = vpop.eup %134 }
  0x16   :  { %v43_v10 = vmul.f32 %v135_v9, %v41_v8  ;;  %vm49_vm1 = vweird.f32 %v135_v9 }
  0x17   :  { %vm50_vm2 = vmor %vm48_vm0, %vm49_vm1 }
  0x18   :  { %v44_v11 = vmul.f32 %v135_v9, %v43_v10 }
  0x1a   :  { %v45_v12 = vmul.f32 0.5, %v44_v11 }
  0x1c   :  { %v46_v13 = vsub.f32 1.5, %v45_v12 }
  0x1e   :  { %v47_v14 = vmul.f32 %v135_v9, %v46_v13 }
  0x20   :  { %v51_v15 = vsel %vm50_vm2, %v135_v9, %v47_v14 }
  0x21   :  { %v52_v19 = vmul.f32 %v51_v15, %v25_v0  ;;  %v53_v20 = vmul.f32 %v51_v15, %v29_v1  ;;  %v54_v21 = vmul.f32 %v51_v15, %v33_v2 }
  0x23   :  { %94 = vst [vmem:[#allocation5] sm:$0xff] %v52_v19  ;;  %v55_v22 = vmul.f32 %v52_v19, %v27_v16  ;;  %v56_v23 = vmul.f32 %v53_v20, %v31_v17  ;;  %v58_v24 = vmul.f32 %v54_v21, %v35_v18 }
  0x24   :  { %100 = vst [vmem:[#allocation5 + $0x18] sm:$0xff] %v53_v20 }
  0x25   :  { %106 = vst [vmem:[#allocation5 + $0x30] sm:$0xff] %v54_v21  ;;  %v57_v25 = vadd.f32 %v56_v23, %v55_v22 }
  0x27   :  { %v59_v26 = vadd.f32 %v58_v24, %v57_v25 }
  0x29   :  { %v60_v27 = vmul.f32 %v59_v26, %v52_v19  ;;  %v62_v28 = vmul.f32 %v59_v26, %v53_v20  ;;  %v64_v29 = vmul.f32 %v59_v26, %v54_v21 }
  0x2b   :  { %v61_v30 = vsub.f32 %v27_v16, %v60_v27  ;;  %v63_v31 = vsub.f32 %v31_v17, %v62_v28  ;;  %v65_v32 = vsub.f32 %v35_v18, %v64_v29 }
  0x2d   :  { %v66_v33 = vmul.f32 %v61_v30, %v61_v30  ;;  %v67_v34 = vmul.f32 %v63_v31, %v63_v31  ;;  %v69_v35 = vmul.f32 %v65_v32, %v65_v32 }
  0x2f   :  { %v68_v36 = vadd.f32 %v67_v34, %v66_v33 }
  0x31   :  { %v70_v37 = vadd.f32 %v69_v35, %v68_v36 }
  0x33   :  { %v71_v38 = vmax.f32 %v70_v37, 1e-24 }
  0x35   :  { %136 = vrsqrt.f32 %v71_v38  ;;  %vm78_vm3 = vweird.f32 %v71_v38 }
  0x3b   :  { %v137_v39 = vpop.eup %136 }
  0x3c   :  { %v73_v40 = vmul.f32 %v137_v39, %v71_v38  ;;  %vm79_vm4 = vweird.f32 %v137_v39 }
  0x3d   :  { %vm80_vm5 = vmor %vm78_vm3, %vm79_vm4 }
  0x3e   :  { %v74_v41 = vmul.f32 %v137_v39, %v73_v40 }
  0x40   :  { %v75_v42 = vmul.f32 0.5, %v74_v41 }
  0x42   :  { %v76_v43 = vsub.f32 1.5, %v75_v42 }
  0x44   :  { %v77_v44 = vmul.f32 %v137_v39, %v76_v43 }
  0x46   :  { %v81_v45 = vsel %vm80_vm5, %v137_v39, %v77_v44 }
  0x47   :  { %v82_v46 = vmul.f32 %v81_v45, %v61_v30  ;;  %v83_v47 = vmul.f32 %v81_v45, %v63_v31  ;;  %v84_v48 = vmul.f32 %v81_v45, %v65_v32 }
  0x49   :  { %96 = vst [vmem:[#allocation5 + $0x8] sm:$0xff] %v82_v46  ;;  %v85_v49 = vmul.f32 %v84_v48, %v53_v20  ;;  %v86_v50 = vmul.f32 %v83_v47, %v54_v21  ;;  %v88_v51 = vmul.f32 %v82_v46, %v54_v21  ;;  %v89_v52 = vmul.f32 %v84_v48, %v52_v19 }
  0x4a   :  { %102 = vst [vmem:[#allocation5 + $0x20] sm:$0xff] %v83_v47  ;;  %v91_v53 = vmul.f32 %v83_v47, %v52_v19  ;;  %v92_v54 = vmul.f32 %v82_v46, %v53_v20 }
  0x4b   :  { %v87_v55 = vsub.f32 %v85_v49, %v86_v50  ;;  %108 = vst [vmem:[#allocation5 + $0x38] sm:$0xff] %v84_v48  ;;  %v90_v56 = vsub.f32 %v88_v51, %v89_v52 }
  0x4c   :  { %v93_v57 = vsub.f32 %v91_v53, %v92_v54 }
  0x4d   :  { %98 = vst [vmem:[#allocation5 + $0x10] sm:$0xff] %v87_v55 }
  0x4e   :  { %104 = vst [vmem:[#allocation5 + $0x28] sm:$0xff] %v90_v56 }
  0x4f   :  { %110 = vst [vmem:[#allocation5 + $0x40] sm:$0xff] %v93_v57 }
  0x50   :  { %123 = dma.vmem_to_hbm [thread:$0]  %s116_s13, 1152, %s118_s16, [#allocation4], %s191_s11, %s191_s11, %s192_s12  }
  0x51   :  { %188 = dma.done.wait [#allocation4], 1152  }
  0x52   :  { %189 = vsyncadd [#allocation4], 4294966144 }
  0x53   :  { %128 = vsyncpa [#allocation3], 1 }
  0x54   :  { %129 = vsyncpa [#allocation4], 1 }

</bundles_post_ra>
